<compile_context>
chip_gen: v6e
topology: v6e:2x2x1
jax: 0.10.0
libtpu: 0.0.40
codegen_flags: <defaults>
</compile_context>

<pallas_src>
import functools
import math

import jax
import jax.numpy as jnp
from jax.experimental import pallas as pl
from jax.experimental.pallas import tpu as pltpu


def _round_up(v, m):
    return (v + m - 1) // m * m


def _shortcut_kernel(x_ref, sel_ref, o_ref, *, nb, C, pad):
    """x_ref: (nb*C, H*W) lane-dense input rows for nb samples.
    sel_ref: (H*W, Ho*Wo) 0/1 selection matrix (both stride-2 subsamples).
    o_ref:  (nb, C_out, Ho*Wo) with C_out = C + 2*pad."""
    HoWo = o_ref.shape[-1]

    # Zero only the channel-pad bands (every output element stored once).
    if pad > 0:
        zeros = jnp.zeros((nb, pad, HoWo), o_ref.dtype)
        o_ref[:, :pad, :] = zeros
        o_ref[:, pad + C:, :] = zeros

    # One full-height MXU matmul per grid step: M = nb*C rows.
    down = jnp.dot(x_ref[...], sel_ref[...],
                   preferred_element_type=jnp.float32).astype(o_ref.dtype)

    # Scatter the data band per sample (static offsets, unrolled at trace time).
    for s in range(nb):
        o_ref[s, pad:pad + C, :] = down[s * C:(s + 1) * C, :]


def _choose_block_batch(N, C, nb_cap):
    """Pick samples-per-grid-step.

    Constraints / preferences:
      * (nb*C) % 8 == 0 or nb == N, so the (nb*C, H*W) input block keeps a
        legal sublane extent.
      * nb divides the (possibly padded) batch.
      * Prefer an even number of grid steps (v7x megacore) when it does not
        cost more than a 2x smaller block.
    Returns (nb, padded_N)."""
    align = 8 // math.gcd(C, 8)
    nb_cap = max(1, min(N, nb_cap))

    divs = [d for d in range(align, nb_cap + 1, align) if N % d == 0]
    if divs:
        nb = divs[-1]
        even = [d for d in divs if (N // d) % 2 == 0]
        if even and even[-1] * 2 >= nb:
            nb = even[-1]
        return nb, N
    if N <= nb_cap:
        # Small batch: one block covering every row (always a legal block).
        return N, N
    # Awkward (e.g. prime) N: pad the batch instead of degenerating to nb=1.
    nb = max(align, (nb_cap // align) * align)
    return nb, _round_up(N, nb)


def lambda_layer(x, planes):
    """Reproduces
        F.pad(x[:, :, ::2, ::2], (0, 0, 0, 0, planes//4, planes//4),
              "constant", 0)
    with a single Pallas TPU kernel."""
    N, C, H, W = x.shape
    if H % 2 or W % 2:
        raise ValueError("stride-2 shortcut expects even spatial dims")
    pad = planes // 4
    C_out = C + 2 * pad
    Ho, Wo = H // 2, W // 2
    HW, HoWo = H * W, Ho * Wo

    # 0/1 selection matrix folding BOTH stride-2 subsamples into one matmul:
    # sel[(2i)*W + 2j, i*Wo + j] = 1.  Built at trace time (a constant); its
    # BlockSpec index never changes, so it stays resident in VMEM.
    r = jnp.arange(HW)
    c = jnp.arange(HoWo)
    target = 2 * (c // Wo) * W + 2 * (c % Wo)
    sel = (r[:, None] == target[None, :]).astype(x.dtype)

    # ---- Generation-aware block-batch sizing -------------------------------
    itemsize = jnp.dtype(x.dtype).itemsize
    in_bytes = C * _round_up(HW, 128) * itemsize
    out_bytes = _round_up(C_out, 8) * _round_up(HoWo, 128) * itemsize
    per_sample = 2 * (in_bytes + out_bytes)          # double-buffered in+out
    sel_bytes = 2 * _round_up(HW, 8) * _round_up(HoWo, 128) * itemsize

    try:
        vmem_cap = int(getattr(pltpu.get_tpu_info(), "vmem_capacity_bytes",
                               64 * 1024 * 1024))
    except Exception:  # pragma: no cover - be robust if the query is missing
        vmem_cap = 64 * 1024 * 1024                  # v7x-safe fallback
    # ~40% of physical VMEM for live blocks: ~48 MiB on v5e/v6e, ~25 MiB v7x.
    budget = min(int(vmem_cap * 0.4), 48 * 1024 * 1024)
    budget_nb = max(1, (budget - sel_bytes) // per_sample)
    nb, N_pad = _choose_block_batch(N, C, budget_nb)
    vmem_limit = int(min(vmem_cap * 0.75, 100 * 1024 * 1024))

    # ---- Lane-dense 2-D presentation of the input --------------------------
    x2d = x.reshape(N * C, HW)                       # free view
    if N_pad != N:
        # Padding the batch (rare, awkward N) beats a long grid of tiny steps.
        x2d = jnp.pad(x2d, ((0, (N_pad - N) * C), (0, 0)))

    kernel = functools.partial(_shortcut_kernel, nb=nb, C=C, pad=pad)

    out = pl.pallas_call(
        kernel,
        out_shape=jax.ShapeDtypeStruct((N_pad, C_out, HoWo), x.dtype),
        grid=(N_pad // nb,),
        in_specs=[
            pl.BlockSpec((nb * C, HW), lambda n: (n, 0)),
            pl.BlockSpec((HW, HoWo), lambda n: (0, 0)),
        ],
        out_specs=pl.BlockSpec((nb, C_out, HoWo), lambda n: (n, 0, 0)),
        compiler_params=pltpu.CompilerParams(
            dimension_semantics=("parallel",),
            vmem_limit_bytes=vmem_limit,
        ),
    )(x2d, sel)

    if N_pad != N:
        out = out[:N]
    return out.reshape(N, C_out, Ho, Wo)


if __name__ == "__main__":
    key = jax.random.PRNGKey(0)
    # Small NCHW input consistent with the CIFAR-ResNeXt usage of LambdaLayer.
    x = jax.random.normal(key, (2, 4, 16, 16), dtype=jnp.float32)
    planes = 8  # shortcut target width; pad = planes // 4 = 2 per side

    y = jax.block_until_ready(lambda_layer(x, planes))

    # Reference (plain JAX) for the same lambda.
    ref = jnp.pad(
        x[:, :, ::2, ::2],
        ((0, 0), (planes // 4, planes // 4), (0, 0), (0, 0)),
        mode="constant",
        constant_values=0.0,
    )

    assert y.shape == ref.shape, (y.shape, ref.shape)
    assert y.dtype == x.dtype
    assert jnp.allclose(y, ref, atol=1e-6), "mismatch vs reference"
    print("KERNEL_OK")
</pallas_src>

<mosaic_0001>
module attributes {stable_mosaic.version = 11 : i64} {
  func.func @_shortcut_kernel(%arg0: i32, %arg1: memref<8x256xf32, #tpu.memory_space<vmem>>, %arg2: memref<256x64xf32, #tpu.memory_space<vmem>>, %arg3: memref<2x8x64xf32, #tpu.memory_space<vmem>>) attributes {dimension_semantics = [#tpu.dimension_semantics<parallel>], iteration_bounds = array<i64: 1>, scalar_prefetch = 0 : i64, scratch_operands = 0 : i64, tpu.core_type = #tpu.core_type<tc>, window_params = [{transform_indices = @transform_0, window_bounds = array<i64: 8, 256>}, {pipeline_mode = #tpu.pipeline_mode<synchronous>, transform_indices = @transform_1, window_bounds = array<i64: 256, 64>}, {transform_indices = @transform_2, window_bounds = array<i64: 2, 8, 64>}]} {
    %cst = arith.constant 0.000000e+00 : f32
    %0 = vector.broadcast %cst : f32 to vector<2x2x64xf32>
    %c0 = arith.constant 0 : index
    %c0_0 = arith.constant 0 : index
    %c0_1 = arith.constant 0 : index
    %1 = vector.load %arg3[%c0, %c0_0, %c0_1] : memref<2x8x64xf32, #tpu.memory_space<vmem>>, vector<2x2x64xf32>
    tpu.vector_store %arg3[%c0, %c0_0, %c0_1], %0 {strides = array<i32>} : memref<2x8x64xf32, #tpu.memory_space<vmem>>, vector<2x2x64xf32>,
    %c0_2 = arith.constant 0 : index
    %c6 = arith.constant 6 : index
    %c0_3 = arith.constant 0 : index
    %2 = vector.load %arg3[%c0_2, %c6, %c0_3] : memref<2x8x64xf32, #tpu.memory_space<vmem>>, vector<2x2x64xf32>
    tpu.vector_store %arg3[%c0_2, %c6, %c0_3], %0 {strides = array<i32>} : memref<2x8x64xf32, #tpu.memory_space<vmem>>, vector<2x2x64xf32>,
    %c0_4 = arith.constant 0 : index
    %c0_5 = arith.constant 0 : index
    %3 = vector.load %arg1[%c0_4, %c0_5] : memref<8x256xf32, #tpu.memory_space<vmem>>, vector<8x256xf32>
    %c0_6 = arith.constant 0 : index
    %c0_7 = arith.constant 0 : index
    %4 = vector.load %arg2[%c0_6, %c0_7] : memref<256x64xf32, #tpu.memory_space<vmem>>, vector<256x64xf32>
    %cst_8 = arith.constant dense<0.000000e+00> : vector<8x64xf32>
    %5 = tpu.matmul %3, %4, %cst_8 {dimension_numbers = #tpu.dot_dimension_numbers<[1], [0], [0], [1], [0, 0, 1, 1], [], []>} : vector<8x256xf32>, vector<256x64xf32>, vector<8x64xf32> -> vector<8x64xf32>
    %6 = vector.extract_strided_slice %5 {offsets = [0, 0], sizes = [4, 64], strides = [1, 1]} : vector<8x64xf32> to vector<4x64xf32>
    %c0_9 = arith.constant 0 : index
    %c2 = arith.constant 2 : index
    %c0_10 = arith.constant 0 : index
    %7 = vector.load %arg3[%c0_9, %c2, %c0_10] : memref<2x8x64xf32, #tpu.memory_space<vmem>>, vector<1x4x64xf32>
    %8 = vector.shape_cast %7 : vector<1x4x64xf32> to vector<4x64xf32>
    %9 = vector.shape_cast %6 : vector<4x64xf32> to vector<1x4x64xf32>
    tpu.vector_store %arg3[%c0_9, %c2, %c0_10], %9 {strides = array<i32>} : memref<2x8x64xf32, #tpu.memory_space<vmem>>, vector<1x4x64xf32>,
    %10 = vector.extract_strided_slice %5 {offsets = [4, 0], sizes = [4, 64], strides = [1, 1]} : vector<8x64xf32> to vector<4x64xf32>
    %c1 = arith.constant 1 : index
    %c2_11 = arith.constant 2 : index
    %c0_12 = arith.constant 0 : index
    %11 = vector.load %arg3[%c1, %c2_11, %c0_12] : memref<2x8x64xf32, #tpu.memory_space<vmem>>, vector<1x4x64xf32>
    %12 = vector.shape_cast %11 : vector<1x4x64xf32> to vector<4x64xf32>
    %13 = vector.shape_cast %10 : vector<4x64xf32> to vector<1x4x64xf32>
    tpu.vector_store %arg3[%c1, %c2_11, %c0_12], %13 {strides = array<i32>} : memref<2x8x64xf32, #tpu.memory_space<vmem>>, vector<1x4x64xf32>,
    return
  }
  func.func @transform_0(%arg0: i32) -> (i32, i32) {
    %c0_i32 = arith.constant 0 : i32
    %c0_i32_0 = arith.constant 0 : i32
    return %arg0, %c0_i32 : i32, i32
  }
  func.func @transform_1(%arg0: i32) -> (i32, i32) {
    %c0_i32 = arith.constant 0 : i32
    %c0_i32_0 = arith.constant 0 : i32
    %c0_i32_1 = arith.constant 0 : i32
    return %c0_i32, %c0_i32_0 : i32, i32
  }
  func.func @transform_2(%arg0: i32) -> (i32, i32, i32) {
    %c0_i32 = arith.constant 0 : i32
    %c0_i32_0 = arith.constant 0 : i32
    %c0_i32_1 = arith.constant 0 : i32
    return %arg0, %c0_i32, %c0_i32_0 : i32, i32, i32
  }
}

</mosaic_0001>

<bundles_post_ra>
// kernel: tpu_custom_call.1
= control target key start
LH: loop header
LB: loop body
LE: loop exit
PB: predicated region body
PF: predicated region fallthrough
CT: control target
= control target key end

     0   :  { %s327_s0 = inlined_call_operand.vmem [shape: f32[8,256], index: 0, kind: input, shape index: {}]   ;;  %s328_s1 = inlined_call_operand.vmem [shape: f32[256,64], index: 1, kind: input, shape index: {}]   ;;  %s329_s2 = inlined_call_operand.hbm [shape: f32[2,8,64], index: 2, kind: output, shape index: {}]  }
   0x1   :  { %v50_v0 = vld [vmem:[%s328_s1 + $0xf8] sm:$0xff]  ;;  %v49_v2 = vld [vmem:[%s328_s1 + $0xf0] sm:$0xff]  ;;  %v48_v4 = vld [vmem:[%s328_s1 + $0xe8] sm:$0xff] }
   0x2   :  { %v34_v1 = vld [vmem:[%s328_s1 + $0x78] sm:$0xff]  ;;  %142 = vmatprep.subr.mxu0 %v50_v0  ;;  %v33_v3 = vld [vmem:[%s328_s1 + $0x70] sm:$0xff]  ;;  %v32_v5 = vld [vmem:[%s328_s1 + $0x68] sm:$0xff] }
   0x3   :  { %143 = vmatpush3.msra.mxu0 %v34_v1  ;;  %v47_v6 = vld [vmem:[%s328_s1 + $0xe0] sm:$0xff]  ;;  %v46_v8 = vld [vmem:[%s328_s1 + $0xd8] sm:$0xff]  ;;  %v45_v10 = vld [vmem:[%s328_s1 + $0xd0] sm:$0xff] }
   0x4   :  { %144 = vmatprep.subr.mxu0 %v49_v2  ;;  %v31_v7 = vld [vmem:[%s328_s1 + $0x60] sm:$0xff]  ;;  %v30_v9 = vld [vmem:[%s328_s1 + $0x58] sm:$0xff]  ;;  %v29_v11 = vld [vmem:[%s328_s1 + $0x50] sm:$0xff] }
   0x5   :  { %145 = vmatpush3.msra.mxu0 %v33_v3  ;;  %v44_v12 = vld [vmem:[%s328_s1 + $0xc8] sm:$0xff] }
   0x6   :  { %146 = vmatprep.subr.mxu0 %v48_v4  ;;  %v18_v13 = vld [vmem:[%s327_s0 + $0x8] sm:$0xff] }
   0x7   :  { %147 = vmatpush3.msra.mxu0 %v32_v5  ;;  %v28_v14 = vld [vmem:[%s328_s1 + $0x48] sm:$0xff]  ;;  %115 = vmatprep.mubr.f32.mxu0 %v18_v13 }
   0x8   :  { %148 = vmatprep.subr.mxu0 %v47_v6 }
   0x9   :  { %149 = vmatpush3.msra.mxu0 %v31_v7 }
   0xa   :  { %150 = vmatprep.subr.mxu0 %v46_v8 }
   0xb   :  { %151 = vmatpush3.msra.mxu0 %v30_v9 }
   0xc   :  { %152 = vmatprep.subr.mxu0 %v45_v10 }
   0xd   :  { %7 = vsyncpa [#allocation3], 0  ;;  %153 = vmatpush3.msra.mxu0 %v29_v11  ;;  %v43_v15 = vld [vmem:[%s328_s1 + $0xc0] sm:$0xff]  ;;  %v42_v17 = vld [vmem:[%s328_s1 + $0xb8] sm:$0xff]  ;;  %vm12_vm0 = vcmask 517120   ;;  %v203_v34 = vmov 0.0  }
   0xe   :  { %154 = vmatprep.subr.mxu0 %v44_v12  ;;  %v27_v16 = vld [vmem:[%s328_s1 + $0x40] sm:$0xff]  ;;  %v26_v18 = vld [vmem:[%s328_s1 + $0x38] sm:$0xff]  ;;  %v41_v19 = vld [vmem:[%s328_s1 + $0xb0] sm:$0xff]  ;;  %13 = vst.msk [vmem:[#allocation2] sm:$0x3] %vm12_vm0, %v203_v34  ;;  %s204_s21 = smov [#allocation2]  }
   0xf   :  { %155 = vmatpush3.msra.mxu0 %v28_v14  ;;  %v25_v20 = vld [vmem:[%s328_s1 + $0x30] sm:$0xff]  ;;  %v40_v21 = vld [vmem:[%s328_s1 + $0xa8] sm:$0xff]  ;;  %v39_v23 = vld [vmem:[%s328_s1 + $0xa0] sm:$0xff]  ;;  %14 = vst.msk [vmem:[#allocation2 + $0x8] sm:$0x3] %vm12_vm0, %v203_v34  ;;  %s131_s22 = sshll.u32 %s204_s21, 4  ;;  %s132_s22 = int_to_ptr.vmem [resolvable:$true] %s131_s22 }
  0x10   :  { %156 = vmatprep.subr.mxu0 %v43_v15  ;;  %v24_v22 = vld [vmem:[%s328_s1 + $0x28] sm:$0xff]  ;;  %v23_v24 = vld [vmem:[%s328_s1 + $0x20] sm:$0xff]  ;;  %v38_v25 = vld [vmem:[%s328_s1 + $0x98] sm:$0xff]  ;;  %15 = vst.msk [vmem:[#allocation2 + $0x6] sm:$0x3] %vm12_vm0, %v203_v34  ;;  %vm121_vm1 = vcmask 519168   ;;  %p186_p1 = scmp.lt.s32.totalorder %s132_s22, %s132_s22 }
  0x11   :  { %157 = vmatpush3.msra.mxu0 %v27_v16  ;;  %v22_v26 = vld [vmem:[%s328_s1 + $0x18] sm:$0xff]  ;;  %v37_v27 = vld [vmem:[%s328_s1 + $0x90] sm:$0xff]  ;;  %v36_v29 = vld [vmem:[%s328_s1 + $0x88] sm:$0xff]  ;;  %16 = vst.msk [vmem:[#allocation2 + $0xe] sm:$0x3] %vm12_vm0, %v203_v34  ;;  %vm124_vm2 = vcmask 523268  }
  0x12   :  { %158 = vmatprep.subr.mxu0 %v42_v17  ;;  %v21_v28 = vld [vmem:[%s328_s1 + $0x10] sm:$0xff]  ;;  %v20_v30 = vld [vmem:[%s328_s1 + $0x8] sm:$0xff]  ;;  %v35_v31 = vld [vmem:[%s328_s1 + $0x80] sm:$0xff] }
  0x13   :  { %159 = vmatpush3.msra.mxu0 %v26_v18  ;;  %v19_v32 = vld [vmem:[%s328_s1] sm:$0xff] }
  0x14   :  { %160 = vmatprep.subr.mxu0 %v41_v19  ;;  %v17_v33 = vld [vmem:[%s327_s0] sm:$0xff]  ;;  %s181_s0 = scalar_lea.vmem %s132_s22, 256 }
  0x15   :  { %161 = vmatpush3.msra.mxu0 %v25_v20  ;;  %p182_p0 = scmp.ne.s32.totalorder %s132_s22, %s181_s0  ;;  %p187_p2 = scmp.lt.s32.totalorder %s181_s0, %s181_s0 }
  0x16   :  { %162 = vmatprep.subr.mxu0 %v40_v21 }
  0x17   :  { %163 = vmatpush3.msra.mxu0 %v24_v22  ;;  %p188_p3 = por %p187_p2, %p186_p1 }
  0x18   :  { %164 = vmatprep.subr.mxu0 %v39_v23 }
  0x19   :  { %165 = vmatpush3.msra.mxu0 %v23_v24  ;;  %p189_p4 = pnand %p188_p3, %p182_p0 }
  0x1a   :  { %166 = vmatprep.subr.mxu0 %v38_v25 }
  0x1b   :  { %167 = vmatpush3.msra.mxu0 %v22_v26 }
  0x1c   :  { %168 = vmatprep.subr.mxu0 %v37_v27 }
  0x1d   :  { %169 = vmatpush3.msra.mxu0 %v21_v28 }
  0x1e   :  { %170 = vmatprep.subr.mxu0 %v36_v29 }
  0x1f   :  { %171 = vmatpush3.msra.mxu0 %v20_v30 }
  0x20   :  { %172 = vmatprep.subr.mxu0 %v35_v31 }
  0x21   :  { %173 = vmatpush3.msra.mxu0 %v19_v32 }
  0x22   :  { %116 = vmatmul.mubr.f32.vlgmr.msra.gmra.mxu0 %v17_v33 }
  0xe2   :  { %v174_v35 = vpop.f32.mrf.mxu0 }
  0xe4   :  { %v175_v36 = vpop.f32.mrf.mxu0 }
  0xe5   :  { %v176_v37 = vadd.f32 %v175_v36, %v174_v35 }
  0xe7   :  { %122 = vst.msk [vmem:[#allocation2 + $0x2] sm:$0xf] %vm121_vm1, %v176_v37 }
  0xe8   :  { %125 = vst.msk [vmem:[#allocation2 + $0x6] sm:$0xf0] %vm124_vm2, %v176_v37 }
  0xe9   :  { %192 = shalt.err (!%p189_p4)
}
  0xea   :  { %s205_s1 = smov 128   ;;  %s206_s23 = smov 8  }
  0xeb   :  { %137 = dma.vmem_to_hbm [thread:$0]  %s132_s22, 256, %s329_s2, [#allocation3], %s205_s1, %s205_s1, %s206_s23  }
  0xec   :  { %201 = dma.done.wait [#allocation3], 256  }
  0xed   :  { %202 = vsyncadd [#allocation3], 4294967040 }
  0xee   :  { %141 = vsyncpa [#allocation3], 1 }

</bundles_post_ra>
